<compile_context>
chip_gen: v6e
topology: v6e:2x2x1
jax: 0.10.0
libtpu: 0.0.40
codegen_flags: <defaults>
</compile_context>

<pallas_src>
import functools

import jax
import jax.numpy as jnp
from jax.experimental import pallas as pl
from jax.experimental.pallas import tpu as pltpu


def _round_up(x, m):
    return (x + m - 1) // m * m


def _tpu_vmem_and_cores():
    """Trace-time query of per-TensorCore VMEM capacity and TC count."""
    cap = 128 << 20
    try:
        info = pltpu.get_tpu_info()
        cap = int(getattr(info, "vmem_capacity_bytes", cap))
    except Exception:
        pass
    # v7x: 64 MiB VMEM per TC and 2 TCs/chip; v5e/v6e: 128 MiB, single TC.
    num_tc = 2 if cap <= (64 << 20) else 1
    return cap, num_tc


def _linear_kernel(x_ref, w_ref, b_ref, o_ref, acc_ref):
    """One (tm, tn) output tile; K is the innermost ('arbitrary') grid axis."""
    k = pl.program_id(2)

    @pl.when(k == 0)
    def _():
        acc_ref[...] = jnp.zeros_like(acc_ref)

    acc_ref[...] += jnp.dot(
        x_ref[...], w_ref[...], preferred_element_type=jnp.float32
    )

    @pl.when(k == pl.num_programs(2) - 1)
    def _():
        # Bias is added exactly once, after the full K reduction.
        o_ref[...] = (acc_ref[...] + b_ref[...]).astype(o_ref.dtype)


def prepare_fnetwork_params(w, b, use_bf16=True):
    """Pad W to lane-dense (Kp, Np) tiles and (optionally) cast to bf16 ONCE.

    Params are static across forward calls, so padding/casting here instead of
    inside fnetwork_forward removes a full extra HBM copy of W per call.

    w: (in_features, out_features) f32   (== PyTorch weight.T)
    b: (1, out_features)           f32
    Returns (w_padded, b) where w_padded is (Kp, Np) with Kp, Np multiples of
    128 (zero-padded) in bf16 (default) or f32; b is returned unpadded f32.
    """
    K, N = w.shape
    Kp = _round_up(K, 128)
    Np = _round_up(N, 128)
    wp = jnp.pad(w, ((0, Kp - K), (0, Np - N)))
    if use_bf16:
        wp = wp.astype(jnp.bfloat16)
    b = jnp.asarray(b, jnp.float32).reshape(1, N)
    return wp, b


@functools.partial(jax.jit, static_argnames=("force_pallas",))
def fnetwork_forward(x, w_padded, b, force_pallas=False):
    """FNetwork.forward: y = x @ w + b.

    x        : (B, in_features)  float32
    w_padded : (Kp, Np)          bf16 or f32, from prepare_fnetwork_params
    b        : (1, out_features) float32 (unpadded)
    """
    B, K = x.shape
    Kp, Np = w_padded.shape
    N = b.shape[1]
    assert Kp % 128 == 0 and Np % 128 == 0 and Kp >= K and Np >= N

    out_dtype = x.dtype
    in_dtype = w_padded.dtype
    in_bytes = jnp.dtype(in_dtype).itemsize
    out_bytes = jnp.dtype(out_dtype).itemsize

    # ---- tiny-problem fast path: padding + pallas dispatch would dominate ----
    if not force_pallas and (B * K + K * N + B * N) * in_bytes < (128 * 1024):
        y = jnp.dot(x.astype(in_dtype), w_padded[:K, :N],
                    preferred_element_type=jnp.float32) + b
        return y.astype(out_dtype)

    # ---- per-generation VMEM budget -----------------------------------------
    vmem_cap, num_tc = _tpu_vmem_and_cores()
    tile_budget = min((vmem_cap * 3) // 8, 48 << 20)   # ~24 MiB v7x, ~48 MiB v5e/v6e
    vmem_limit = min((vmem_cap * 3) // 4, 100 << 20)   # raise scoped-VMEM limit

    # ---- M plan: one block whenever B is modest (bf16 needs 16 sublanes) -----
    sub = 16 if in_bytes == 2 else 8
    if B <= 512:
        tm = Mp = _round_up(max(B, sub), sub)
    else:
        tm = 256 if B % 256 == 0 else 128
        Mp = _round_up(B, tm)

    # ---- N/K tiles: largest 128-multiple divisors that fit the VMEM budget ---
    tn_cands = [t for t in range(min(Np, 512), 0, -128) if Np % t == 0]
    tk_cands = [t for t in range(min(Kp, 2048), 0, -128) if Kp % t == 0]
    best = None
    for tn_c in tn_cands:
        for tk_c in tk_cands:
            working_set = (2 * tm * tk_c * in_bytes     # x, double-buffered
                           + 3 * tk_c * tn_c * in_bytes  # w, up to triple-buffered
                           + 2 * tm * tn_c * out_bytes   # out, double-buffered
                           + tm * tn_c * 4               # f32 accumulator
                           + 2 * tn_c * 4)               # bias
            if working_set <= tile_budget:
                score = (tk_c * tn_c, tk_c)
                if best is None or score > best[0]:
                    best = (score, tn_c, tk_c)
    if best is None:
        tn, tk = tn_cands[-1], tk_cands[-1]
    else:
        tn, tk = best[1], best[2]

    # ---- v7x megacore: guarantee >= 2 parallel blocks so no TC idles ---------
    if num_tc >= 2 and (Mp // tm) == 1 and (Np // tn) < 2:
        for t in tn_cands:          # descending -> largest tn with >= 2 blocks
            if Np // t >= 2:
                tn = t
                break

    grid = (Mp // tm, Np // tn, Kp // tk)
    grid_k = grid[2]

    # 3-deep weight buffering hides exposed weight DMA (mainly v5e) when there
    # are enough K steps to pipeline; otherwise default double-buffering.
    if grid_k >= 3:
        w_spec = pl.BlockSpec((tk, tn), lambda i, j, k: (k, j),
                              pipeline_mode=pl.Buffered(3))
    else:
        w_spec = pl.BlockSpec((tk, tn), lambda i, j, k: (k, j))

    # ---- pad activations only (weights were padded once at prepare time) -----
    xp = jnp.pad(x, ((0, Mp - B), (0, Kp - K))).astype(in_dtype)
    bp = jnp.pad(b.astype(jnp.float32), ((0, 0), (0, Np - N)))

    cost = pl.CostEstimate(
        flops=2 * Mp * Np * Kp,
        transcendentals=0,
        # Account for re-fetches: x is read once per N block, w once per M block.
        bytes_accessed=(Mp * Kp * (Np // tn) * in_bytes
                        + Kp * Np * (Mp // tm) * in_bytes
                        + Np * (Mp // tm) * 4
                        + Mp * Np * out_bytes),
    )

    yp = pl.pallas_call(
        _linear_kernel,
        out_shape=jax.ShapeDtypeStruct((Mp, Np), out_dtype),
        grid_spec=pltpu.PrefetchScalarGridSpec(
            num_scalar_prefetch=0,
            grid=grid,
            in_specs=[
                pl.BlockSpec((tm, tk), lambda i, j, k: (i, k)),   # x tile
                w_spec,                                           # w tile
                pl.BlockSpec((1, tn), lambda i, j, k: (0, j)),    # bias row tile
            ],
            out_specs=pl.BlockSpec((tm, tn), lambda i, j, k: (i, j)),
            scratch_shapes=[pltpu.VMEM((tm, tn), jnp.float32)],
        ),
        compiler_params=pltpu.CompilerParams(
            dimension_semantics=("parallel", "parallel", "arbitrary"),
            vmem_limit_bytes=int(vmem_limit),
        ),
        cost_estimate=cost,
    )(xp, w_padded, bp)

    return yp[:B, :N]


def init_fnetwork_params(key, n_action, embed_dim, k=1):
    """Deterministic init matching nn.Linear default (uniform +/- 1/sqrt(fan_in))."""
    in_features = embed_dim * k
    out_features = n_action * k
    kw, kb = jax.random.split(key)
    bound = 1.0 / jnp.sqrt(jnp.float32(in_features))
    # Stored pre-transposed relative to PyTorch: (in_features, out_features).
    w = jax.random.uniform(kw, (in_features, out_features), jnp.float32,
                           minval=-bound, maxval=bound)
    b = jax.random.uniform(kb, (1, out_features), jnp.float32,
                           minval=-bound, maxval=bound)
    return w, b


if __name__ == "__main__":
    key = jax.random.PRNGKey(0)

    # --- Test 1: the module's own toy shapes (embed_dim=32, n_action=16, k=1),
    #     f32 weights, Pallas path forced so the kernel itself is exercised. ---
    n_action, embed_dim = 16, 32
    batch = 8
    k1, k2, key = jax.random.split(key, 3)
    x = jax.random.normal(k1, (batch, embed_dim), jnp.float32)
    w, b = init_fnetwork_params(k2, n_action, embed_dim)
    wp, bq = prepare_fnetwork_params(w, b, use_bf16=False)

    y = fnetwork_forward(x, wp, bq, force_pallas=True)
    jax.block_until_ready(y)
    y_ref = x @ w + b
    assert y.shape == (batch, n_action)
    assert jnp.allclose(y, y_ref, atol=1e-4, rtol=1e-4)

    # --- Test 1b: tiny-shape XLA fast path (default dispatch). ---
    y_fast = fnetwork_forward(x, wp, bq)
    jax.block_until_ready(y_fast)
    assert jnp.allclose(y_fast, y_ref, atol=1e-4, rtol=1e-4)

    # --- Test 2: bf16 weights (default), non-128-multiple batch (single 192-row
    #     M block), multi-block-capable N grid on v7x. ---
    n2, e2 = 256, 384
    b2_ = 192
    k3, k4, key = jax.random.split(key, 3)
    x2 = jax.random.normal(k3, (b2_, e2), jnp.float32)
    w2, bias2 = init_fnetwork_params(k4, n2, e2)
    wp2, bq2 = prepare_fnetwork_params(w2, bias2)          # bf16 by default

    y2 = fnetwork_forward(x2, wp2, bq2, force_pallas=True)
    jax.block_until_ready(y2)
    ref2_bf = (x2.astype(jnp.bfloat16).astype(jnp.float32)
               @ w2.astype(jnp.bfloat16).astype(jnp.float32)) + bias2
    assert y2.shape == (b2_, n2)
    assert jnp.allclose(y2, ref2_bf, atol=2e-3, rtol=2e-3)
    assert jnp.allclose(y2, x2 @ w2 + bias2, atol=5e-2, rtol=5e-2)

    # --- Test 3: multi-step K reduction (exercises accumulator init/finalize). ---
    n3, e3 = 512, 2304
    b3_ = 64
    k5, k6 = jax.random.split(key)
    x3 = jax.random.normal(k5, (b3_, e3), jnp.float32)
    w3, bias3 = init_fnetwork_params(k6, n3, e3)
    wp3, bq3 = prepare_fnetwork_params(w3, bias3)

    y3 = fnetwork_forward(x3, wp3, bq3, force_pallas=True)
    jax.block_until_ready(y3)
    ref3_bf = (x3.astype(jnp.bfloat16).astype(jnp.float32)
               @ w3.astype(jnp.bfloat16).astype(jnp.float32)) + bias3
    assert y3.shape == (b3_, n3)
    assert jnp.allclose(y3, ref3_bf, atol=3e-3, rtol=3e-3)

    print("KERNEL_OK")
</pallas_src>

<mosaic_0001>
module attributes {stable_mosaic.version = 11 : i64} {
  func.func @_linear_kernel(%arg0: i32, %arg1: i32, %arg2: i32, %arg3: memref<8x128xf32, #tpu.memory_space<vmem>>, %arg4: memref<128x128xf32, #tpu.memory_space<vmem>>, %arg5: memref<1x128xf32, #tpu.memory_space<vmem>>, %arg6: memref<8x128xf32, #tpu.memory_space<vmem>>, %arg7: memref<8x128xf32, #tpu.memory_space<vmem>>) attributes {dimension_semantics = [#tpu.dimension_semantics<parallel>, #tpu.dimension_semantics<parallel>, #tpu.dimension_semantics<arbitrary>], iteration_bounds = array<i64: 1, 1, 1>, scalar_prefetch = 0 : i64, scratch_operands = 1 : i64, tpu.core_type = #tpu.core_type<tc>, window_params = [{transform_indices = @transform_0, window_bounds = array<i64: 8, 128>}, {transform_indices = @transform_1, window_bounds = array<i64: 128, 128>}, {transform_indices = @transform_2, window_bounds = array<i64: 1, 128>}, {transform_indices = @transform_3, window_bounds = array<i64: 8, 128>}]} {
    %c0_i32 = arith.constant 0 : i32
    %0 = arith.cmpi eq, %arg2, %c0_i32 : i32
    %1 = arith.extui %0 : i1 to i32
    %c0_i32_0 = arith.constant 0 : i32
    %2 = arith.cmpi ne, %1, %c0_i32_0 : i32
    scf.if %2 {
      %cst_10 = arith.constant 0.000000e+00 : f32
      %12 = vector.broadcast %cst_10 : f32 to vector<8x128xf32>
      %c0_11 = arith.constant 0 : index
      %c0_12 = arith.constant 0 : index
      %13 = vector.load %arg7[%c0_11, %c0_12] : memref<8x128xf32, #tpu.memory_space<vmem>>, vector<8x128xf32>
      tpu.vector_store %arg7[%c0_11, %c0_12], %12 {strides = array<i32>} : memref<8x128xf32, #tpu.memory_space<vmem>>, vector<8x128xf32>,
    } else {
    }
    %c0 = arith.constant 0 : index
    %c0_1 = arith.constant 0 : index
    %3 = vector.load %arg7[%c0, %c0_1] : memref<8x128xf32, #tpu.memory_space<vmem>>, vector<8x128xf32>
    %c0_2 = arith.constant 0 : index
    %c0_3 = arith.constant 0 : index
    %4 = vector.load %arg3[%c0_2, %c0_3] : memref<8x128xf32, #tpu.memory_space<vmem>>, vector<8x128xf32>
    %c0_4 = arith.constant 0 : index
    %c0_5 = arith.constant 0 : index
    %5 = vector.load %arg4[%c0_4, %c0_5] : memref<128x128xf32, #tpu.memory_space<vmem>>, vector<128x128xf32>
    %cst = arith.constant dense<0.000000e+00> : vector<8x128xf32>
    %6 = tpu.matmul %4, %5, %cst {dimension_numbers = #tpu.dot_dimension_numbers<[1], [0], [0], [1], [0, 0, 1, 1], [], []>} : vector<8x128xf32>, vector<128x128xf32>, vector<8x128xf32> -> vector<8x128xf32>
    %7 = arith.addf %3, %6 : vector<8x128xf32>
    %c0_6 = arith.constant 0 : index
    %c0_7 = arith.constant 0 : index
    %8 = vector.load %arg7[%c0_6, %c0_7] : memref<8x128xf32, #tpu.memory_space<vmem>>, vector<8x128xf32>
    tpu.vector_store %arg7[%c0_6, %c0_7], %7 {strides = array<i32>} : memref<8x128xf32, #tpu.memory_space<vmem>>, vector<8x128xf32>,
    %c0_i32_8 = arith.constant 0 : i32
    %9 = arith.cmpi eq, %arg2, %c0_i32_8 : i32
    %10 = arith.extui %9 : i1 to i32
    %c0_i32_9 = arith.constant 0 : i32
    %11 = arith.cmpi ne, %10, %c0_i32_9 : i32
    scf.if %11 {
      %c0_10 = arith.constant 0 : index
      %c0_11 = arith.constant 0 : index
      %12 = vector.load %arg7[%c0_10, %c0_11] : memref<8x128xf32, #tpu.memory_space<vmem>>, vector<8x128xf32>
      %c0_12 = arith.constant 0 : index
      %c0_13 = arith.constant 0 : index
      %13 = vector.load %arg5[%c0_12, %c0_13] : memref<1x128xf32, #tpu.memory_space<vmem>>, vector<1x128xf32>
      %14 = vector.broadcast %13 : vector<1x128xf32> to vector<8x128xf32>
      %15 = arith.addf %12, %14 : vector<8x128xf32>
      %c0_14 = arith.constant 0 : index
      %c0_15 = arith.constant 0 : index
      %16 = vector.load %arg6[%c0_14, %c0_15] : memref<8x128xf32, #tpu.memory_space<vmem>>, vector<8x128xf32>
      tpu.vector_store %arg6[%c0_14, %c0_15], %15 {strides = array<i32>} : memref<8x128xf32, #tpu.memory_space<vmem>>, vector<8x128xf32>,
    } else {
    }
    return
  }
  func.func @transform_0(%arg0: i32, %arg1: i32, %arg2: i32) -> (i32, i32) {
    %c0_i32 = arith.constant 0 : i32
    return %arg0, %arg2 : i32, i32
  }
  func.func @transform_1(%arg0: i32, %arg1: i32, %arg2: i32) -> (i32, i32) {
    %c0_i32 = arith.constant 0 : i32
    return %arg2, %arg1 : i32, i32
  }
  func.func @transform_2(%arg0: i32, %arg1: i32, %arg2: i32) -> (i32, i32) {
    %c0_i32 = arith.constant 0 : i32
    %c0_i32_0 = arith.constant 0 : i32
    return %c0_i32, %arg1 : i32, i32
  }
  func.func @transform_3(%arg0: i32, %arg1: i32, %arg2: i32) -> (i32, i32) {
    %c0_i32 = arith.constant 0 : i32
    return %arg0, %arg1 : i32, i32
  }
}

</mosaic_0001>

<bundles_post_ra>
// kernel: fnetwork_forward.1
= control target key start
LH: loop header
LB: loop body
LE: loop exit
PB: predicated region body
PF: predicated region fallthrough
CT: control target
= control target key end

     0   :  { %8 = vsyncpa [#allocation4], 0  ;;  %s293_s0 = inlined_call_operand.vmem [shape: f32[8,128], index: 0, kind: input, shape index: {}]   ;;  %s294_s1 = inlined_call_operand.hbm [shape: f32[128,128], index: 1, kind: input, shape index: {}]   ;;  %s295_s2 = inlined_call_operand.vmem [shape: f32[1,128], index: 2, kind: input, shape index: {}]   ;;  %s296_s3 = inlined_call_operand.hbm [shape: f32[8,128], index: 3, kind: output, shape index: {}]  }
   0x1   :  { %9 = vsyncpa [#allocation5], 0  ;;  %s255_s12 = smov [#allocation3]  }
   0x2   :  { %s17_s13 = sshll.u32 %s255_s12, 4  ;;  %s18_s13 = int_to_ptr.vmem [resolvable:$true] %s17_s13 }
   0x3   :  { %s219_s14 = scalar_lea.vmem %s18_s13, 2048  ;;  %p224_p1 = scmp.lt.s32.totalorder %s18_s13, %s18_s13 }
   0x4   :  { %p220_p0 = scmp.ne.s32.totalorder %s18_s13, %s219_s14  ;;  %p225_p2 = scmp.lt.s32.totalorder %s219_s14, %s219_s14 }
   0x6   :  { %p226_p3 = por %p225_p2, %p224_p1 }
   0x8   :  { %p227_p4 = pnand %p226_p3, %p220_p0 }
   0xa   :  { %230 = shalt.err (!%p227_p4)
}
   0xb   :  { %s256_s15 = smov 128   ;;  %s257_s16 = smov 8  }
   0xc   :  { %23 = dma.hbm_to_vmem [thread:$0]  %s294_s1, 2048, %s18_s13, [#allocation4], %s256_s15, %s256_s15, %s257_s16  }
   0xd   :  { %251 = dma.done.wait [#allocation4], 2048  }
   0xe   :  { %252 = vsyncadd [#allocation4], 4294965248  ;;  %v258_v0 = vmov 0.0   ;;  %vm259_vm0 = vmmov 0   ;;  %v51_v1 = vld [vmem:[#allocation3 + $0x78] sm:$0xff]  ;;  %v50_v2 = vld [vmem:[#allocation3 + $0x70] sm:$0xff] }
   0xf   :  { %170 = vmatprep.subr.mxu0 %v258_v0  ;;  %202 = vmatprep.mubr.msk.f32.mxu0 %vm259_vm0, %v258_v0  ;;  %v49_v3 = vld [vmem:[#allocation3 + $0x68] sm:$0xff]  ;;  %v48_v4 = vld [vmem:[#allocation3 + $0x60] sm:$0xff]  ;;  %v47_v5 = vld [vmem:[#allocation3 + $0x58] sm:$0xff]  ;;  %s260_s22 = smov [#allocation6]  }
  0x10   :  { %171 = vmatpush3.msra.mxu0 %v51_v1  ;;  %v46_v6 = vld [vmem:[#allocation3 + $0x50] sm:$0xff]  ;;  %v45_v7 = vld [vmem:[#allocation3 + $0x48] sm:$0xff]  ;;  %v44_v8 = vld [vmem:[#allocation3 + $0x40] sm:$0xff]  ;;  %s143_s23 = sshll.u32 %s260_s22, 4  ;;  %s144_s23 = int_to_ptr.vmem [resolvable:$true] %s143_s23 }
  0x11   :  { %172 = vmatprep.subr.mxu0 %v258_v0  ;;  %v43_v9 = vld [vmem:[#allocation3 + $0x38] sm:$0xff]  ;;  %v42_v10 = vld [vmem:[#allocation3 + $0x30] sm:$0xff]  ;;  %v41_v11 = vld [vmem:[#allocation3 + $0x28] sm:$0xff]  ;;  %s231_s24 = scalar_lea.vmem %s144_s23, 128  ;;  %p236_p6 = scmp.lt.s32.totalorder %s144_s23, %s144_s23 }
  0x12   :  { %173 = vmatpush3.msra.mxu0 %v50_v2  ;;  %v40_v12 = vld [vmem:[#allocation3 + $0x20] sm:$0xff]  ;;  %v39_v13 = vld [vmem:[#allocation3 + $0x18] sm:$0xff]  ;;  %v38_v14 = vld [vmem:[#allocation3 + $0x10] sm:$0xff]  ;;  %p232_p5 = scmp.ne.s32.totalorder %s144_s23, %s231_s24  ;;  %p237_p7 = scmp.lt.s32.totalorder %s231_s24, %s231_s24 }
  0x13   :  { %174 = vmatprep.subr.mxu0 %v258_v0  ;;  %v37_v15 = vld [vmem:[#allocation3 + $0x8] sm:$0xff]  ;;  %v36_v16 = vld [vmem:[#allocation3] sm:$0xff] }
  0x14   :  { %175 = vmatpush3.msra.mxu0 %v49_v3  ;;  %v35_v17 = vld [vmem:[%s293_s0] sm:$0xff]  ;;  %p238_p8 = por %p237_p7, %p236_p6 }
  0x15   :  { %176 = vmatprep.subr.mxu0 %v258_v0  ;;  %v152_v18 = vld [vmem:[%s295_s2] ss:$0 sm:$0xff] }
  0x16   :  { %177 = vmatpush3.msra.mxu0 %v48_v4  ;;  %p239_p9 = pnand %p238_p8, %p232_p5 }
  0x17   :  { %178 = vmatprep.subr.mxu0 %v258_v0 }
  0x18   :  { %179 = vmatpush3.msra.mxu0 %v47_v5 }
  0x19   :  { %180 = vmatprep.subr.mxu0 %v258_v0 }
  0x1a   :  { %181 = vmatpush3.msra.mxu0 %v46_v6 }
  0x1b   :  { %182 = vmatprep.subr.mxu0 %v258_v0 }
  0x1c   :  { %183 = vmatpush3.msra.mxu0 %v45_v7 }
  0x1d   :  { %184 = vmatprep.subr.mxu0 %v258_v0 }
  0x1e   :  { %185 = vmatpush3.msra.mxu0 %v44_v8 }
  0x1f   :  { %186 = vmatprep.subr.mxu0 %v258_v0 }
  0x20   :  { %187 = vmatpush3.msra.mxu0 %v43_v9 }
  0x21   :  { %188 = vmatprep.subr.mxu0 %v258_v0 }
  0x22   :  { %189 = vmatpush3.msra.mxu0 %v42_v10 }
  0x23   :  { %190 = vmatprep.subr.mxu0 %v258_v0 }
  0x24   :  { %191 = vmatpush3.msra.mxu0 %v41_v11 }
  0x25   :  { %192 = vmatprep.subr.mxu0 %v258_v0 }
  0x26   :  { %193 = vmatpush3.msra.mxu0 %v40_v12 }
  0x27   :  { %194 = vmatprep.subr.mxu0 %v258_v0 }
  0x28   :  { %195 = vmatpush3.msra.mxu0 %v39_v13 }
  0x29   :  { %196 = vmatprep.subr.mxu0 %v258_v0 }
  0x2a   :  { %197 = vmatpush3.msra.mxu0 %v38_v14 }
  0x2b   :  { %198 = vmatprep.subr.mxu0 %v258_v0 }
  0x2c   :  { %199 = vmatpush3.msra.mxu0 %v37_v15 }
  0x2d   :  { %200 = vmatprep.subr.mxu0 %v258_v0 }
  0x2e   :  { %201 = vmatpush3.msra.mxu0 %v36_v16 }
  0x2f   :  { %203 = vmatmul.mubr.f32.vlgmr.msra.gmra.mxu0 %v35_v17 }
  0xef   :  { %v118_v19 = vpop.f32.mrf.mxu0 }
  0xf0   :  { %v135_v20 = vadd.f32 %v152_v18, %v118_v19 }
  0xf1   :  { %v204_v21 = vpop.f32.mrf.mxu0 }
  0xf2   :  { %136 = vst [vmem:[#allocation6] sm:$0xff] %v135_v20 }
  0xf3   :  { %242 = shalt.err (!%p239_p9)
}
  0xf4   :  { %146 = dma.vmem_to_hbm [thread:$0]  %s144_s23, 128, %s296_s3, [#allocation5]  }
  0xf5   :  { %253 = dma.done.wait [#allocation5], 128  }
  0xf6   :  { %254 = vsyncadd [#allocation5], 4294967168 }
  0xf7   :  { %150 = vsyncpa [#allocation4], 1 }
  0xf8   :  { %151 = vsyncpa [#allocation5], 1 }

</bundles_post_ra>
